<compile_context>
chip_gen: v7x
topology: tpu7x:2x2x1
jax: 0.10.0
libtpu: 0.0.40
codegen_flags: <defaults>
</compile_context>

<pallas_src>
import math

import jax
import jax.numpy as jnp
from jax.experimental import pallas as pl
from jax.experimental.pallas import tpu as pltpu

# ---------------------------------------------------------------------------
# Problem sizes
# ---------------------------------------------------------------------------
B = 512          # total batch processed by one pallas_call (grid-tiled)
B_TILE = 128     # batch rows per grid step (raise to 256 on v6e/v7x for fuller MXU rows)
M = 8            # latent dim
HID = 32         # decoder hidden width
C, H, W = 1, 16, 16
D = C * H * W    # flattened event size (the 3 Independent event dims)
SCALE = 0.1      # fixed Normal scale from the module

_NEG_HALF_INV_VAR = -0.5 / (SCALE * SCALE)
_LOG_NORM_CONST = D * (-math.log(SCALE) - 0.5 * math.log(2.0 * math.pi))


# ---------------------------------------------------------------------------
# Pallas kernel: decoder MLP + Independent(Normal(., 0.1), 3).log_prob(x)
# ---------------------------------------------------------------------------
def gaussian_decoder_kernel(z_ref, w1_ref, b1_ref, w2_ref, b2_ref, x_ref,
                            mean_ref, lp_ref):
    # hidden = relu(z @ W1 + b1)     (B_TILE, HID); bf16 MXU operands, f32 accumulate.
    h = jnp.dot(z_ref[...], w1_ref[...], preferred_element_type=jnp.float32)
    h = jnp.maximum(h + b1_ref[...], 0.0)

    # means = h @ W2 + b2            (B_TILE, D); epilogue stays f32.
    mu = jnp.dot(h.astype(jnp.bfloat16), w2_ref[...],
                 preferred_element_type=jnp.float32)
    mu = mu + b2_ref[...]
    mean_ref[...] = mu

    # Independent(Normal(mu, SCALE), 3).log_prob(x):
    #   lp_b = -0.5/s^2 * sum_d (x_bd - mu_bd)^2 + D*(-log s - 0.5*log 2*pi)
    diff = x_ref[...] - mu
    sq = diff * diff
    # Reduce over D with an NT matmul against a ones block: the result arrives as a
    # lane-dense row (unmasked stores) and the reduction runs on the MXU instead of
    # the XLU. All 8 result rows are identical; keep row 0.
    ones_rows = jnp.ones((8, D), dtype=jnp.float32)
    ssq8 = jax.lax.dot_general(
        ones_rows, sq,
        dimension_numbers=(((1,), (1,)), ((), ())),
        preferred_element_type=jnp.float32)          # (8, B_TILE)
    lp_ref[...] = _NEG_HALF_INV_VAR * ssq8[0:1, :] + _LOG_NORM_CONST


def gaussian_decoder_forward(z, w1, b1, w2, b2, x_nchw):
    """Returns (means in NCHW, log_prob(x)) of the Independent Normal."""
    assert z.shape == (B, M) and x_nchw.shape == (B, C, H, W)
    assert B % B_TILE == 0
    n_tiles = B // B_TILE

    # bf16 MXU operands (halves weight/latent DMA bytes, 2x MXU peak on v6e/v7x);
    # biases and the data point x stay f32 so the log-prob epilogue is exact.
    z_b = z.astype(jnp.bfloat16)
    w1_b = w1.astype(jnp.bfloat16)
    w2_b = w2.astype(jnp.bfloat16)
    x_flat = x_nchw.reshape(B, D)

    means_flat, lp_row = pl.pallas_call(
        gaussian_decoder_kernel,
        out_shape=(
            jax.ShapeDtypeStruct((B, D), jnp.float32),
            jax.ShapeDtypeStruct((1, B), jnp.float32),   # lane-dense lp slab
        ),
        grid=(n_tiles,),
        in_specs=[
            pl.BlockSpec((B_TILE, M), lambda i: (i, 0)),   # z: advances with the grid
            pl.BlockSpec((M, HID), lambda i: (0, 0)),      # W1: pinned, VMEM-resident
            pl.BlockSpec((1, HID), lambda i: (0, 0)),      # b1: pinned
            pl.BlockSpec((HID, D), lambda i: (0, 0)),      # W2: pinned
            pl.BlockSpec((1, D), lambda i: (0, 0)),        # b2: pinned
            pl.BlockSpec((B_TILE, D), lambda i: (i, 0)),   # x: advances with the grid
        ],
        out_specs=(
            pl.BlockSpec((B_TILE, D), lambda i: (i, 0)),   # means
            pl.BlockSpec((1, B_TILE), lambda i: (0, i)),   # lp row block (lane-dense)
        ),
        compiler_params=pltpu.CompilerParams(
            dimension_semantics=("parallel",)),            # shards tiles across v7x TCs
    )(z_b, w1_b, b1, w2_b, b2, x_flat)

    means = means_flat.reshape(B, C, H, W)   # NCHW, like the torch decoder_net
    return means, lp_row[0]


# ---------------------------------------------------------------------------
# Pure-JAX reference (same bf16 quantization points as the kernel, so the check
# isolates the Pallas lowering; bf16 products are exact in f32).
# ---------------------------------------------------------------------------
def reference_forward(z, w1, b1, w2, b2, x_nchw):
    q = lambda a: a.astype(jnp.bfloat16).astype(jnp.float32)
    h = jnp.maximum(q(z) @ q(w1) + b1, 0.0)
    means_flat = q(h) @ q(w2) + b2
    means = means_flat.reshape(B, C, H, W)
    diff = (x_nchw - means) / SCALE
    elem_lp = -0.5 * diff * diff - math.log(SCALE) - 0.5 * math.log(2.0 * math.pi)
    lp = jnp.sum(elem_lp, axis=(1, 2, 3))
    return means, lp


if __name__ == "__main__":
    key = jax.random.PRNGKey(0)
    kz, kw1, kb1, kw2, kb2, kx = jax.random.split(key, 6)

    # Deterministic synthetic parameters (no checkpoint loading).
    z = jax.random.normal(kz, (B, M), dtype=jnp.float32)
    w1 = jax.random.normal(kw1, (M, HID), dtype=jnp.float32) * (1.0 / math.sqrt(M))
    b1 = jax.random.normal(kb1, (1, HID), dtype=jnp.float32) * 0.01
    w2 = jax.random.normal(kw2, (HID, D), dtype=jnp.float32) * (1.0 / math.sqrt(HID))
    b2 = jax.random.normal(kb2, (1, D), dtype=jnp.float32) * 0.01
    # Data points to evaluate the Independent-Normal log_prob on.
    x = jax.random.normal(kx, (B, C, H, W), dtype=jnp.float32)

    means, lp = gaussian_decoder_forward(z, w1, b1, w2, b2, x)
    jax.block_until_ready((means, lp))

    means_ref, lp_ref = reference_forward(z, w1, b1, w2, b2, x)
    assert means.shape == (B, C, H, W)
    assert lp.shape == (B,)
    assert jnp.allclose(means, means_ref, atol=1e-3, rtol=1e-3), \
        float(jnp.max(jnp.abs(means - means_ref)))
    assert jnp.allclose(lp, lp_ref, atol=2.0, rtol=1e-3), \
        float(jnp.max(jnp.abs(lp - lp_ref)))

    # TODO(synk): td.Independent(td.Normal(...)).sample()/rsample (random draw from the
    # returned distribution object) is not part of the forward hot path and is left out;
    # (means, log_prob) fully define the returned distribution.
    # TODO(synk): for the ensemble use-case, stack E decoders' weights along a leading
    # grid axis (or block-diagonal W2) to amortize one pallas_call over all members.
    print("KERNEL_OK")
</pallas_src>

<mosaic_0001>
module attributes {stable_mosaic.version = 11 : i64} {
  func.func @gaussian_decoder_kernel(%arg0: i32, %arg1: memref<128x8xbf16, #tpu.memory_space<vmem>>, %arg2: memref<8x32xbf16, #tpu.memory_space<vmem>>, %arg3: memref<1x32xf32, #tpu.memory_space<vmem>>, %arg4: memref<32x256xbf16, #tpu.memory_space<vmem>>, %arg5: memref<1x256xf32, #tpu.memory_space<vmem>>, %arg6: memref<128x256xf32, #tpu.memory_space<vmem>>, %arg7: memref<128x256xf32, #tpu.memory_space<vmem>>, %arg8: memref<1x128xf32, #tpu.memory_space<vmem>>) attributes {dimension_semantics = [#tpu.dimension_semantics<parallel>], iteration_bounds = array<i64: 4>, scalar_prefetch = 0 : i64, scratch_operands = 0 : i64, tpu.core_type = #tpu.core_type<tc>, window_params = [{transform_indices = @transform_0, window_bounds = array<i64: 128, 8>}, {pipeline_mode = #tpu.pipeline_mode<synchronous>, transform_indices = @transform_1, window_bounds = array<i64: 8, 32>}, {pipeline_mode = #tpu.pipeline_mode<synchronous>, transform_indices = @transform_2, window_bounds = array<i64: 1, 32>}, {pipeline_mode = #tpu.pipeline_mode<synchronous>, transform_indices = @transform_3, window_bounds = array<i64: 32, 256>}, {pipeline_mode = #tpu.pipeline_mode<synchronous>, transform_indices = @transform_4, window_bounds = array<i64: 1, 256>}, {transform_indices = @transform_5, window_bounds = array<i64: 128, 256>}, {transform_indices = @transform_6, window_bounds = array<i64: 128, 256>}, {transform_indices = @transform_7, window_bounds = array<i64: 1, 128>}]} {
    %c0 = arith.constant 0 : index
    %c0_0 = arith.constant 0 : index
    %0 = vector.load %arg1[%c0, %c0_0] : memref<128x8xbf16, #tpu.memory_space<vmem>>, vector<128x8xbf16>
    %c0_1 = arith.constant 0 : index
    %c0_2 = arith.constant 0 : index
    %1 = vector.load %arg2[%c0_1, %c0_2] : memref<8x32xbf16, #tpu.memory_space<vmem>>, vector<8x32xbf16>
    %cst = arith.constant dense<0.000000e+00> : vector<128x32xf32>
    %2 = tpu.matmul %0, %1, %cst {dimension_numbers = #tpu.dot_dimension_numbers<[1], [0], [0], [1], [0, 0, 1, 1], [], []>} : vector<128x8xbf16>, vector<8x32xbf16>, vector<128x32xf32> -> vector<128x32xf32>
    %c0_3 = arith.constant 0 : index
    %c0_4 = arith.constant 0 : index
    %3 = vector.load %arg3[%c0_3, %c0_4] : memref<1x32xf32, #tpu.memory_space<vmem>>, vector<1x32xf32>
    %4 = vector.broadcast %3 : vector<1x32xf32> to vector<128x32xf32>
    %5 = arith.addf %2, %4 : vector<128x32xf32>
    %cst_5 = arith.constant 0.000000e+00 : f32
    %6 = vector.broadcast %cst_5 : f32 to vector<128x32xf32>
    %7 = arith.maximumf %5, %6 : vector<128x32xf32>
    %8 = arith.truncf %7 : vector<128x32xf32> to vector<128x32xbf16>
    %c0_6 = arith.constant 0 : index
    %c0_7 = arith.constant 0 : index
    %9 = vector.load %arg4[%c0_6, %c0_7] : memref<32x256xbf16, #tpu.memory_space<vmem>>, vector<32x256xbf16>
    %cst_8 = arith.constant dense<0.000000e+00> : vector<128x256xf32>
    %10 = tpu.matmul %8, %9, %cst_8 {dimension_numbers = #tpu.dot_dimension_numbers<[1], [0], [0], [1], [0, 0, 1, 1], [], []>} : vector<128x32xbf16>, vector<32x256xbf16>, vector<128x256xf32> -> vector<128x256xf32>
    %c0_9 = arith.constant 0 : index
    %c0_10 = arith.constant 0 : index
    %11 = vector.load %arg5[%c0_9, %c0_10] : memref<1x256xf32, #tpu.memory_space<vmem>>, vector<1x256xf32>
    %12 = vector.broadcast %11 : vector<1x256xf32> to vector<128x256xf32>
    %13 = arith.addf %10, %12 : vector<128x256xf32>
    %c0_11 = arith.constant 0 : index
    %c0_12 = arith.constant 0 : index
    %14 = vector.load %arg7[%c0_11, %c0_12] : memref<128x256xf32, #tpu.memory_space<vmem>>, vector<128x256xf32>
    tpu.vector_store %arg7[%c0_11, %c0_12], %13 {strides = array<i32>} : memref<128x256xf32, #tpu.memory_space<vmem>>, vector<128x256xf32>,
    %c0_13 = arith.constant 0 : index
    %c0_14 = arith.constant 0 : index
    %15 = vector.load %arg6[%c0_13, %c0_14] : memref<128x256xf32, #tpu.memory_space<vmem>>, vector<128x256xf32>
    %16 = arith.subf %15, %13 : vector<128x256xf32>
    %17 = arith.mulf %16, %16 : vector<128x256xf32>
    %cst_15 = arith.constant 1.000000e+00 : f32
    %18 = vector.broadcast %cst_15 : f32 to vector<8x256xf32>
    %cst_16 = arith.constant dense<0.000000e+00> : vector<8x128xf32>
    %19 = tpu.matmul %18, %17, %cst_16 {dimension_numbers = #tpu.dot_dimension_numbers<[1], [1], [0], [0], [0, 0, 1, 0], [], []>} : vector<8x256xf32>, vector<128x256xf32>, vector<8x128xf32> -> vector<8x128xf32>
    %20 = vector.extract_strided_slice %19 {offsets = [0, 0], sizes = [1, 128], strides = [1, 1]} : vector<8x128xf32> to vector<1x128xf32>
    %cst_17 = arith.constant -5.000000e+01 : f32
    %21 = vector.broadcast %cst_17 : f32 to vector<1x128xf32>
    %22 = arith.mulf %21, %20 : vector<1x128xf32>
    %cst_18 = arith.constant 354.213531 : f32
    %23 = vector.broadcast %cst_18 : f32 to vector<1x128xf32>
    %24 = arith.addf %22, %23 : vector<1x128xf32>
    %c0_19 = arith.constant 0 : index
    %c0_20 = arith.constant 0 : index
    %25 = vector.load %arg8[%c0_19, %c0_20] : memref<1x128xf32, #tpu.memory_space<vmem>>, vector<1x128xf32>
    tpu.vector_store %arg8[%c0_19, %c0_20], %24 {strides = array<i32>} : memref<1x128xf32, #tpu.memory_space<vmem>>, vector<1x128xf32>,
    return
  }
  func.func @transform_0(%arg0: i32) -> (i32, i32) {
    %c0_i32 = arith.constant 0 : i32
    %c0_i32_0 = arith.constant 0 : i32
    return %arg0, %c0_i32 : i32, i32
  }
  func.func @transform_1(%arg0: i32) -> (i32, i32) {
    %c0_i32 = arith.constant 0 : i32
    %c0_i32_0 = arith.constant 0 : i32
    %c0_i32_1 = arith.constant 0 : i32
    return %c0_i32, %c0_i32_0 : i32, i32
  }
  func.func @transform_2(%arg0: i32) -> (i32, i32) {
    %c0_i32 = arith.constant 0 : i32
    %c0_i32_0 = arith.constant 0 : i32
    %c0_i32_1 = arith.constant 0 : i32
    return %c0_i32, %c0_i32_0 : i32, i32
  }
  func.func @transform_3(%arg0: i32) -> (i32, i32) {
    %c0_i32 = arith.constant 0 : i32
    %c0_i32_0 = arith.constant 0 : i32
    %c0_i32_1 = arith.constant 0 : i32
    return %c0_i32, %c0_i32_0 : i32, i32
  }
  func.func @transform_4(%arg0: i32) -> (i32, i32) {
    %c0_i32 = arith.constant 0 : i32
    %c0_i32_0 = arith.constant 0 : i32
    %c0_i32_1 = arith.constant 0 : i32
    return %c0_i32, %c0_i32_0 : i32, i32
  }
  func.func @transform_5(%arg0: i32) -> (i32, i32) {
    %c0_i32 = arith.constant 0 : i32
    %c0_i32_0 = arith.constant 0 : i32
    return %arg0, %c0_i32 : i32, i32
  }
  func.func @transform_6(%arg0: i32) -> (i32, i32) {
    %c0_i32 = arith.constant 0 : i32
    %c0_i32_0 = arith.constant 0 : i32
    return %arg0, %c0_i32 : i32, i32
  }
  func.func @transform_7(%arg0: i32) -> (i32, i32) {
    %c0_i32 = arith.constant 0 : i32
    %c0_i32_0 = arith.constant 0 : i32
    return %c0_i32, %arg0 : i32, i32
  }
}

</mosaic_0001>

<bundles_post_ra>
// kernel: tpu_custom_call.1
= control target key start
LH: loop header
LB: loop body
LE: loop exit
PB: predicated region body
PF: predicated region fallthrough
CT: control target
= control target key end

     0   :  { %13 = vsyncpa [#allocation3], 0  ;;  %s1784_s0 = inlined_call_operand.vmem [shape: bf16[512,8], index: 0, kind: input, shape index: {}]   ;;  %s1785_s1 = inlined_call_operand.vmem [shape: bf16[8,32], index: 1, kind: input, shape index: {}]   ;;  %s1786_s2 = inlined_call_operand.vmem [shape: f32[1,32], index: 2, kind: input, shape index: {}]   ;;  %s1787_s3 = inlined_call_operand.vmem [shape: bf16[32,256], index: 3, kind: input, shape index: {}]   ;;  %s1788_s4 = inlined_call_operand.vmem [shape: f32[1,256], index: 4, kind: input, shape index: {}]   ;;  %s1789_s5 = inlined_call_operand.hbm [shape: f32[512,256], index: 5, kind: input, shape index: {}]   ;;  %s1790_s6 = inlined_call_operand.hbm [shape: f32[512,256], index: 6, kind: output, shape index: {0}]   ;;  %s1791_s7 = inlined_call_operand.hbm [shape: f32[1,512], index: 7, kind: output, shape index: {1}]  }
   0x1   :  { %15 = vsyncpa [#allocation3 + $0x1], 0 }
   0x2   :  { %16 = vsyncpa [#allocation4], 0 }
   0x3   :  { %18 = vsyncpa [#allocation4 + $0x1], 0 }
   0x4   :  { %19 = vsyncpa [#allocation7], 0 }
   0x5   :  { %21 = vsyncpa [#allocation7 + $0x1], 0  ;;  %s1429_s24 = smov 0   ;;  %s1431_s25 = smov 0  }
   0x6   :  { %s1433_s26 = smov 0   ;;  %s1435_s27 = smov 0  }
   0x7 LB: > { %s1450_s28 = sadd.s32 4294967295, %s1378_s27   ;;  %s1067_s29 = sadd.s32 4294967294, %s1378_s27   ;;  %s1378_s27 = sphi %s1435_s27, %s1803_s27   ;;  %s1374_s26 = sphi %s1433_s26, %s1802_s26   ;;  %s1370_s25 = sphi %s1431_s25, %s1801_s25   ;;  %s1366_s24 = sphi %s1429_s24, %s1800_s24  }
   0x8   : > { %s1454_s30 = sadd.s32 1, %s1378_s27   ;;  %s144_s8 = sadd.s32 1, %s1374_s26 }
   0x9   : > { %s141_s9 = ssub.s32 %s1378_s27, %s1454_s30  ;;  %p151_p0 = scmp.ne.s32.totalorder %s1374_s26, %s1370_s25 }
   0xa   : > { %p142_p1 = scmp.eq.s32.totalorder %s141_s9, 0  ;;  %p152_p2 = scmp.eq.s32.totalorder %s1378_s27, 0 }
   0xb   : > { %p157_p3 = scmp.ne.s32.totalorder %s1370_s25, %s1366_s24  ;;  %p158_p4 = scmp.eq.s32.totalorder %s1450_s28, 0 }
   0xc   : > { %s1466_s10 = scalar_select %p142_p1, %s1374_s26, %s144_s8  }
   0xd   : > { %p1468_p5 = por %p152_p2, %p151_p0  ;;  %p1472_p6 = por %p158_p4, %p157_p3 }
   0xe   : > { %p181_p7 = scmp.eq.s32.totalorder %s1450_s28, 3  ;;  %p187_p8 = scmp.eq.s32.totalorder %s1067_s29, 3 }
   0xf   : > { %p1196_p9 = scmp.lt.s32.totalorder %s1378_s27, 4  ;;  %s254_s15 = sand.u32 1, %s1374_s26  }
  0x10   : > { %p1478_p10 = por %p181_p7, %p151_p0  ;;  %p1482_p11 = por %p187_p8, %p157_p3 }
  0x11   : > { %s1116_s16 = sshll.u32 %s1378_s27, 12  ;;  %s1070_s17 = sshll.u32 %s254_s15, 8 }
  0x12   : > { %s1795_s13 = scalar_select %p1478_p10, 1, 0 }
  0x13   : > { %s1796_s14 = scalar_select %p1482_p11, 1, 0 }
  0x14   : > { %s1491_s20 = scalar_lea.hbm %s1789_s5, %s1116_s16  ;;  %s258_s21 = scalar_lea.vmem [#allocation2], %s1070_s17 }
  0x15   : > { %s266_s22 = sshll.u32 %s258_s21, 4  ;;  %p1495_p12 = pnand %p1196_p9, %p1468_p5  ;;  %s1499_s22 = int_to_ptr.vmem [resolvable:$true] %s266_s22 }
  0x16   : > { %s1501_s29 = scalar_lea.sflag [#allocation3], %s254_s15  ;;  %s1250_s8 = scalar_lea.hbm %s1491_s20, 4096 }
  0x17   : > { %p1251_p13 = scmp.ne.s32.totalorder %s1491_s20, %s1250_s8  ;;  %p1252_p0 = pneg %p1495_p12 }
  0x18   : > { %s1255_s16 = scalar_lea.hbm %s1789_s5, 16384  ;;  %p1256_p3 = scmp.lt.u32.totalorder %s1491_s20, %s1789_s5 }
  0x19   : > { %p1253_p1 = pnand %p1252_p0, %p1251_p13  ;;  %p1257_p4 = scmp.lt.u32.totalorder %s1255_s16, %s1250_s8 }
  0x1a   : > { %p1259_p7 = scmp.lt.u32.totalorder %s1250_s8, %s1491_s20 }
  0x1b   : > { %p1254_p2 = pneg %p1253_p1  ;;  %p1258_p5 = por %p1257_p4, %p1256_p3 }
  0x1d   : > { %p1260_p8 = por %p1259_p7, %p1258_p5 }
  0x1f   : > { %p1261_p9 = pnand %p1260_p8, %p1254_p2 }
  0x21   : > { %1264 = shalt.err (!%p1261_p9)
}
  0x22   : > { %s1265_s15 = scalar_lea.vmem %s1499_s22, 4096  ;;  %s1380_s19 = smov [#allocation2]  }
  0x23   : > { %p1266_p13 = scmp.ne.s32.totalorder %s1499_s22, %s1265_s15  ;;  %s1270_s21 = sshll.u32 %s1380_s19, 4  ;;  %s1271_s21 = int_to_ptr.vmem [resolvable:$false] %s1270_s21 }
  0x24   : > { %s1272_s9 = scalar_lea.vmem %s1271_s21, 8192  ;;  %p1273_p10 = scmp.lt.s32.totalorder %s1499_s22, %s1271_s21 }
  0x25   : > { %p1268_p1 = pnand %p1266_p13, %p1252_p0  ;;  %p1274_p3 = scmp.lt.s32.totalorder %s1272_s9, %s1265_s15 }
  0x27   : > { %p1269_p11 = pneg %p1268_p1  ;;  %p1275_p4 = por %p1274_p3, %p1273_p10 }
  0x29   : > { %p1276_p5 = pnand %p1275_p4, %p1269_p11 }
  0x2b   : > { %1279 = shalt.err (!%p1276_p5)
}
  0x2c   : > { %s1381_s8 = smov 256   ;;  %s1382_s11 = smov 16  }
  0x2d   : > { %1188 = dma.hbm_to_vmem [thread:$0]  (!%p1495_p12), %s1491_s20, 4096, %s1499_s22, %s1501_s29, %s1381_s8, %s1381_s8, %s1382_s11  }
  0x2e   : > { %p1074_p0 = scmp.ge.s32.totalorder %s1378_s27, 1  ;;  %p274_p2 = scmp.lt.s32.totalorder %s1378_s27, 5 }
  0x30   : > { %p275_p7 = pnand %p1074_p0, %p274_p2 }
  0x31   : > { %s1532_s16 = sand.u32 (!%p275_p7), 1, %s1370_s25  }
  0x32   : > { %278 = sbr.rel (%p275_p7) target bundleno = 805 (0x325), region = 44  ;;  %s1075_s17 = sshll.u32 (!%p275_p7), %s1532_s16, 8 }
  0x33   : > { %s281_s18 = scalar_lea.sflag (!%p275_p7), [#allocation3], %s1532_s16  ;;  %s1538_s15 = scalar_lea.vmem (!%p275_p7), [#allocation2], %s1075_s17 }
  0x39   : > { %1353 = dma.done.wait (%p1472_p6), %s281_s18, 4096  }
  0x3a   : > { %1355 = vsyncadd (%p1472_p6), %s281_s18, 4294963200  ;;  %s1545_s20 = sshll.u32 %s1450_s28, 4  ;;  %vm422_vm0 = vcmask 1043456   ;;  %vm397_vm1 = vcmask 64512   ;;  %v349_v0 = vld [vmem:[%s1785_s1] sm:$0xf] }
  0x3b   : > { %p325_p10 = scmp.lt.s32.totalorder %s1545_s20, 63  ;;  %1178 = vmatprep.subr.msk.bf16.mxu0 %vm422_vm0, %v349_v0  ;;  %v424_v1 = vsel %vm422_vm0, %v349_v0, 0  ;;  %v1244_v10 = vld [vmem:[%s1787_s3 + $0x4] ss:$8 sps:$4 sm:$0xff]   ;;  %v1246_v11 = vld [vmem:[%s1787_s3] ss:$8 sps:$4 sm:$0xff]  }
  0x3c   : > { %1129 = vmatpush3.bf16.msra.mxu0 %v424_v1  ;;  %608 = vmatprep.subr.bf16.mxu1 %v1244_v10  ;;  %v1247_v12 = vld [vmem:[%s1787_s3 + $0x14] ss:$8 sps:$4 sm:$0xff]   ;;  %v1249_v13 = vld [vmem:[%s1787_s3 + $0x10] ss:$8 sps:$4 sm:$0xff]   ;;  %v1383_v14 = vmov 0   ;;  %vm583_vm2 = vcmask 261120  }
  0x3d   : > { %s326_s22 = scalar_select %p325_p10, %s1545_s20, 63  ;;  %609 = vmatpush1.bf16.msra.mxu1 %v1246_v11  ;;  %640 = vmatprep.mubr.bf16.mxu1 %v1383_v14  ;;  %v1079_v15 = vld [vmem:[%s1786_s2] ss:$0 sm:$0xff] }
  0x3e   : > { %610 = vmatprep.subr.bf16.mxu1 %v1247_v12  ;;  %v551_v12 = vld [vmem:[%s1788_s4] sm:$0x3]  ;;  %s1609_s18 = scalar_lea.vmem [#allocation5], %s1075_s17  ;;  %s1118_s17 = sshll.u32 %s1450_s28, 12 }
  0x3f   : > { %s1078_s23 = sshll.u32 %s326_s22, 2  ;;  %s1708_s29 = scalar_lea.hbm %s1790_s6, %s1118_s17 }
  0x40   : > { %s328_s21 = scalar_lea.vmem %s1784_s0, %s1078_s23  ;;  %s923_s19 = scalar_lea.sflag [#allocation4], %s1532_s16 }
  0x41   : > { %v1236_v2 = vld [vmem:[%s328_s21] sm:$0xff]   ;;  %v1237_v3 = vld [vmem:[%s328_s21 + $0x8] sm:$0xff]   ;;  %v1238_v4 = vld [vmem:[%s328_s21 + $0x10] sm:$0xff]   ;;  %611 = vmatpush1.bf16.msra.mxu1 %v1249_v13  ;;  %p1798_p11 = scmp.ne.s32.totalorder %s1795_s13, 0 }
  0x42   : > { %1130 = vmatprep.mubr.msk.bf16.mxu0 %vm397_vm1, %v1236_v2  ;;  %v1239_v5 = vld [vmem:[%s328_s21 + $0x18] sm:$0xff]   ;;  %v1240_v6 = vld [vmem:[%s328_s21 + $0x20] sm:$0xff]   ;;  %v1241_v7 = vld [vmem:[%s328_s21 + $0x28] sm:$0xff]  }
  0x43   : > { %1131 = vmatmul.mubr.msk.bf16.vlgmr.msra.gmra.mrb[0].mxu0 %vm397_vm1, %v1237_v3  ;;  %v1242_v8 = vld [vmem:[%s328_s21 + $0x30] sm:$0xff]   ;;  %v1243_v9 = vld [vmem:[%s328_s21 + $0x38] sm:$0xff]   ;;  %s1385_s21 = smov [#allocation5]  }
  0x44   : > { %1134 = vmatprep.mubr.msk.bf16.mxu0 %vm397_vm1, %v1238_v4  ;;  %s1284_s8 = sshll.u32 %s1385_s21, 4  ;;  %s1285_s8 = int_to_ptr.vmem [resolvable:$false] %s1284_s8 }
  0x45   : > { %s1286_s28 = scalar_lea.vmem %s1285_s8, 8192 }
  0x4b   : > { %1135 = vmatmul.mubr.msk.bf16.gmra.mrb[4].mxu0 %vm397_vm1, %v1239_v5 }
  0x4c   : > { %1138 = vmatprep.mubr.msk.bf16.mxu0 %vm397_vm1, %v1240_v6 }
  0x53   : > { %1139 = vmatmul.mubr.msk.bf16.gmra.mrb[8].mxu0 %vm397_vm1, %v1241_v7 }
  0x54   : > { %1142 = vmatprep.mubr.msk.bf16.mxu0 %vm397_vm1, %v1242_v8  ;;  %v1384_v8 = vmov 1.0  }
  0x5b   : > { %1143 = vmatmul.mubr.msk.bf16.gmra.mrb[12].mxu0 %vm397_vm1, %v1243_v9  ;;  %v553_v9 = vlaneseq }
  0x5c   : > { %913 = vmatprep.mubr.f32.mxu0 %v1384_v8 }
  0x5d   : > { %v554_v10 = vshrl.u32 %v553_v9, 7 }
  0x5f   : > { %v555_v11 = vsub.s32 0, %v554_v10  ;;  %v559_v13 = vsub.s32 1, %v554_v10 }
 0x116   : > { %v1132_v16 = vpop.f32.mrb[0].mxu0 }
 0x117   : > { %v469_v17 = vadd.f32 %v1132_v16, %v1079_v15  ;;  %v460_v18 = vpop.f32.mrb[1].mxu0  ;;  %v1600_v16 = vrot.slane %v551_v12, %v559_v13 }
 0x118   : > { %v461_v19 = vadd.f32 %v1079_v15, %v460_v18  ;;  %v1133_v20 = vpop.f32.mrb[2].mxu0 }
 0x119   : > { %v472_v21 = vadd.f32 %v1133_v20, %v1079_v15  ;;  %v463_v22 = vpop.f32.mrb[3].mxu0  ;;  %v525_v24 = vmax.f32 %v469_v17, 0.0  ;;  %v753_v17 = vld [vmem:[%s1538_s15] sm:$0xff]  ;;  %v754_v20 = vld [vmem:[%s1538_s15 + $0x8] sm:$0xff] }
 0x11a   : > { %v464_v23 = vadd.f32 %v1079_v15, %v463_v22  ;;  %v523_v26 = vmax.f32 %v461_v19, 0.0 }
 0x11b   : > { %v526_v25 = vmax.f32 %v472_v21, 0.0 }
 0x11c   : > { %v524_v27 = vmax.f32 %v464_v23, 0.0  ;;  %v755_v23 = vld [vmem:[%s1538_s15 + $0x10] sm:$0xff] }
 0x11d   : > { %v540_v28 = vpack.c.bf16 %v526_v25, %v525_v24 }
 0x11e   : > { %v539_v29 = vpack.c.bf16 %v524_v27, %v523_v26  ;;  %v1136_v30 = vpop.f32.mrb[4].mxu0  ;;  %v756_v27 = vld [vmem:[%s1538_s15 + $0x18] sm:$0xff] }
 0x11f   : > { %v485_v31 = vadd.f32 %v1136_v30, %v1079_v15  ;;  %v476_v32 = vpop.f32.mrb[5].mxu0 }
 0x120   : > { %1100 = vmatmul.mubr.msk.bf16.vlgmr.msra.gmra.mrb[0].mxu1 %vm583_vm2, %v539_v29  ;;  %v477_v33 = vadd.f32 %v1079_v15, %v476_v32  ;;  %v1137_v34 = vpop.f32.mrb[6].mxu0 }
 0x121   : > { %v529_v35 = vmax.f32 %v485_v31, 0.0  ;;  %v488_v36 = vadd.f32 %v1137_v34, %v1079_v15  ;;  %v479_v37 = vpop.f32.mrb[7].mxu0  ;;  %650 = vmatprep.mubr.bf16.mxu1 %v1383_v14 }
 0x122   : > { %v527_v38 = vmax.f32 %v477_v33, 0.0  ;;  %v480_v39 = vadd.f32 %v1079_v15, %v479_v37  ;;  %v757_v37 = vld [vmem:[%s1538_s15 + $0x20] sm:$0xff] }
 0x123   : > { %v530_v40 = vmax.f32 %v488_v36, 0.0 }
 0x124   : > { %v528_v41 = vmax.f32 %v480_v39, 0.0 }
 0x125   : > { %v542_v42 = vpack.c.bf16 %v530_v40, %v529_v35 }
 0x126   : > { %v541_v43 = vpack.c.bf16 %v528_v41, %v527_v38  ;;  %v1140_v44 = vpop.f32.mrb[8].mxu0  ;;  %v758_v41 = vld [vmem:[%s1538_s15 + $0x28] sm:$0xff] }
 0x127   : > { %v501_v45 = vadd.f32 %v1140_v44, %v1079_v15  ;;  %v492_v46 = vpop.f32.mrb[9].mxu0  ;;  %v759_v44 = vld [vmem:[%s1538_s15 + $0x30] sm:$0xff] }
 0x128   : > { %1101 = vmatmul.mubr.msk.bf16.gmra.mrb[4].mxu1 %vm583_vm2, %v540_v28  ;;  %v493_v47 = vadd.f32 %v1079_v15, %v492_v46  ;;  %v1141_v48 = vpop.f32.mrb[10].mxu0 }
 0x129   : > { %660 = vmatprep.mubr.bf16.mxu1 %v1383_v14  ;;  %v533_v49 = vmax.f32 %v501_v45, 0.0  ;;  %v504_v50 = vadd.f32 %v1141_v48, %v1079_v15  ;;  %v495_v51 = vpop.f32.mrb[11].mxu0 }
 0x12a   : > { %v531_v52 = vmax.f32 %v493_v47, 0.0  ;;  %v496_v53 = vadd.f32 %v1079_v15, %v495_v51 }
 0x12b   : > { %v534_v54 = vmax.f32 %v504_v50, 0.0 }
 0x12c   : > { %v532_v55 = vmax.f32 %v496_v53, 0.0 }
 0x12d   : > { %v544_v56 = vpack.c.bf16 %v534_v54, %v533_v49  ;;  %v760_v49 = vld [vmem:[%s1538_s15 + $0x38] sm:$0xff] }
 0x12e   : > { %v543_v57 = vpack.c.bf16 %v532_v55, %v531_v52  ;;  %v1144_v58 = vpop.f32.mrb[12].mxu0 }
 0x12f   : > { %v517_v59 = vadd.f32 %v1144_v58, %v1079_v15  ;;  %v508_v60 = vpop.f32.mrb[13].mxu0 }
 0x130   : > { %1102 = vmatmul.mubr.msk.bf16.gmra.mrb[8].mxu1 %vm583_vm2, %v541_v43  ;;  %v509_v61 = vadd.f32 %v1079_v15, %v508_v60  ;;  %v1145_v62 = vpop.f32.mrb[14].mxu0 }
 0x131   : > { %670 = vmatprep.mubr.bf16.mxu1 %v1383_v14  ;;  %v537_v63 = vmax.f32 %v517_v59, 0.0  ;;  %v520_v0 = vadd.f32 %v1145_v62, %v1079_v15  ;;  %v511_v1 = vpop.f32.mrb[15].mxu0  ;;  %v761_v59 = vld [vmem:[%s1538_s15 + $0x40] sm:$0xff] }
 0x132   : > { %v535_v2 = vmax.f32 %v509_v61, 0.0  ;;  %v512_v3 = vadd.f32 %v1079_v15, %v511_v1  ;;  %v1598_v15 = vrot.slane %v551_v12, %v555_v11 }
 0x133   : > { %v538_v4 = vmax.f32 %v520_v0, 0.0 }
 0x134   : > { %v536_v5 = vmax.f32 %v512_v3, 0.0 }
 0x135   : > { %v546_v6 = vpack.c.bf16 %v538_v4, %v537_v63  ;;  %v762_v63 = vld [vmem:[%s1538_s15 + $0x48] sm:$0xff] }
 0x136   : > { %v545_v7 = vpack.c.bf16 %v536_v5, %v535_v2  ;;  %v763_v2 = vld [vmem:[%s1538_s15 + $0x50] sm:$0xff] }
 0x138   : > { %1103 = vmatmul.mubr.msk.bf16.gmra.mrb[12].mxu1 %vm583_vm2, %v542_v42 }
 0x139   : > { %680 = vmatprep.mubr.bf16.mxu1 %v1383_v14 }
 0x140   : > { %1104 = vmatmul.mubr.msk.bf16.gmra.mrb[16].mxu1 %vm583_vm2, %v543_v57 }
 0x141   : > { %690 = vmatprep.mubr.bf16.mxu1 %v1383_v14 }
 0x148   : > { %1105 = vmatmul.mubr.msk.bf16.gmra.mrb[20].mxu1 %vm583_vm2, %v544_v56 }
 0x149   : > { %700 = vmatprep.mubr.bf16.mxu1 %v1383_v14 }
 0x150   : > { %1106 = vmatmul.mubr.msk.bf16.gmra.mrb[24].mxu1 %vm583_vm2, %v545_v7  ;;  %v764_v7 = vld [vmem:[%s1538_s15 + $0x58] sm:$0xff] }
 0x151   : > { %710 = vmatprep.mubr.bf16.mxu1 %v1383_v14 }
 0x158   : > { %1107 = vmatmul.mubr.msk.bf16.gmra.mrb[28].mxu1 %vm583_vm2, %v546_v6 }
 0x1f3   : > { %v642_v14 = vpop.f32.mrb[0].mxu1 }
 0x1f4   : > { %v643_v18 = vadd.f32 %v642_v14, %v1598_v15  ;;  %v644_v19 = vpop.f32.mrb[1].mxu1 }
 0x1f5   : > { %v645_v21 = vadd.f32 %v644_v19, %v1600_v16  ;;  %v646_v22 = vpop.f32.mrb[2].mxu1 }
 0x1f6   : > { %721 = vst [vmem:[%s1609_s18] sm:$0xff] %v643_v18  ;;  %v785_v24 = vsub.f32 %v753_v17, %v643_v18  ;;  %v647_v25 = vadd.f32 %v646_v22, %v1598_v15  ;;  %v648_v26 = vpop.f32.mrb[3].mxu1 }
 0x1f7   : > { %722 = vst [vmem:[%s1609_s18 + $0x8] sm:$0xff] %v645_v21  ;;  %v786_v28 = vsub.f32 %v754_v20, %v645_v21  ;;  %v649_v29 = vadd.f32 %v648_v26, %v1600_v16  ;;  %v765_v20 = vld [vmem:[%s1538_s15 + $0x60] sm:$0xff] }
 0x1f8   : > { %723 = vst [vmem:[%s1609_s18 + $0x10] sm:$0xff] %v647_v25  ;;  %v787_v30 = vsub.f32 %v755_v23, %v647_v25  ;;  %v817_v32 = vmul.f32 %v785_v24, %v785_v24  ;;  %v766_v24 = vld [vmem:[%s1538_s15 + $0x68] sm:$0xff] }
 0x1f9   : > { %724 = vst [vmem:[%s1609_s18 + $0x18] sm:$0xff] %v649_v29  ;;  %v788_v31 = vsub.f32 %v756_v27, %v649_v29  ;;  %v818_v34 = vmul.f32 %v786_v28, %v786_v28  ;;  %v767_v27 = vld [vmem:[%s1538_s15 + $0x70] sm:$0xff] }
 0x1fa   : > { %v819_v33 = vmul.f32 %v787_v30, %v787_v30 }
 0x1fb   : > { %v820_v35 = vmul.f32 %v788_v31, %v788_v31  ;;  %v652_v36 = vpop.f32.mrb[4].mxu1 }
 0x1fc   : > { %v1148_v38 = vpack.c.bf16 %v819_v33, %v817_v32  ;;  %v653_v39 = vadd.f32 %v652_v36, %v1598_v15  ;;  %v654_v40 = vpop.f32.mrb[5].mxu1  ;;  %v768_v32 = vld [vmem:[%s1538_s15 + $0x78] sm:$0xff] }
 0x1fd   : > { %v655_v42 = vadd.f32 %v654_v40, %v1600_v16  ;;  %v656_v43 = vpop.f32.mrb[6].mxu1  ;;  %v1146_v45 = vpack.c.bf16 %v820_v35, %v818_v34 }
 0x1fe   : > { %725 = vst [vmem:[%s1609_s18 + $0x20] sm:$0xff] %v653_v39  ;;  %v789_v46 = vsub.f32 %v757_v37, %v653_v39  ;;  %v657_v47 = vadd.f32 %v656_v43, %v1598_v15  ;;  %v658_v48 = vpop.f32.mrb[7].mxu1 }
 0x1ff   : > { %726 = vst [vmem:[%s1609_s18 + $0x28] sm:$0xff] %v655_v42  ;;  %v790_v50 = vsub.f32 %v758_v41, %v655_v42  ;;  %v659_v51 = vadd.f32 %v658_v48, %v1600_v16  ;;  %1147 = vmatprep.subr.bf16.mxu0 %v1146_v45  ;;  %v769_v42 = vld [vmem:[%s1538_s15 + $0x80] sm:$0xff] }
 0x200   : > { %727 = vst [vmem:[%s1609_s18 + $0x30] sm:$0xff] %v657_v47  ;;  %v791_v52 = vsub.f32 %v759_v44, %v657_v47  ;;  %1149 = vmatpush1.bf16.xpose.msra.mxu0 %v1148_v38  ;;  %v821_v54 = vmul.f32 %v789_v46, %v789_v46  ;;  %v770_v46 = vld [vmem:[%s1538_s15 + $0x88] sm:$0xff] }
 0x201   : > { %728 = vst [vmem:[%s1609_s18 + $0x38] sm:$0xff] %v659_v51  ;;  %v792_v53 = vsub.f32 %v760_v49, %v659_v51  ;;  %v822_v56 = vmul.f32 %v790_v50, %v790_v50  ;;  %v771_v49 = vld [vmem:[%s1538_s15 + $0x90] sm:$0xff] }
 0x202   : > { %v823_v55 = vmul.f32 %v791_v52, %v791_v52 }
 0x203   : > { %v824_v57 = vmul.f32 %v792_v53, %v792_v53  ;;  %v662_v58 = vpop.f32.mrb[8].mxu1 }
 0x204   : > { %v1152_v60 = vpack.c.bf16 %v823_v55, %v821_v54  ;;  %v663_v61 = vadd.f32 %v662_v58, %v1598_v15  ;;  %v664_v62 = vpop.f32.mrb[9].mxu1  ;;  %v772_v54 = vld [vmem:[%s1538_s15 + $0x98] sm:$0xff] }
 0x205   : > { %v665_v0 = vadd.f32 %v664_v62, %v1600_v16  ;;  %v666_v1 = vpop.f32.mrb[10].mxu1  ;;  %v1150_v3 = vpack.c.bf16 %v824_v57, %v822_v56 }
 0x206   : > { %729 = vst [vmem:[%s1609_s18 + $0x40] sm:$0xff] %v663_v61  ;;  %v793_v4 = vsub.f32 %v761_v59, %v663_v61  ;;  %v667_v5 = vadd.f32 %v666_v1, %v1598_v15  ;;  %v668_v6 = vpop.f32.mrb[11].mxu1 }
 0x207   : > { %730 = vst [vmem:[%s1609_s18 + $0x48] sm:$0xff] %v665_v0  ;;  %v794_v9 = vsub.f32 %v762_v63, %v665_v0  ;;  %v669_v10 = vadd.f32 %v668_v6, %v1600_v16  ;;  %1151 = vmatprep.subr.bf16.mxu0 %v1150_v3  ;;  %v773_v0 = vld [vmem:[%s1538_s15 + $0xa0] sm:$0xff] }
 0x208   : > { %731 = vst [vmem:[%s1609_s18 + $0x50] sm:$0xff] %v667_v5  ;;  %v795_v11 = vsub.f32 %v763_v2, %v667_v5  ;;  %1153 = vmatpush1.bf16.xpose.msra.mxu0 %v1152_v60  ;;  %v825_v13 = vmul.f32 %v793_v4, %v793_v4  ;;  %v774_v4 = vld [vmem:[%s1538_s15 + $0xa8] sm:$0xff] }
 0x209   : > { %732 = vst [vmem:[%s1609_s18 + $0x58] sm:$0xff] %v669_v10  ;;  %v796_v12 = vsub.f32 %v764_v7, %v669_v10  ;;  %v826_v17 = vmul.f32 %v794_v9, %v794_v9  ;;  %v775_v7 = vld [vmem:[%s1538_s15 + $0xb0] sm:$0xff] }
 0x20a   : > { %v827_v14 = vmul.f32 %v795_v11, %v795_v11 }
 0x20b   : > { %v828_v18 = vmul.f32 %v796_v12, %v796_v12  ;;  %v672_v19 = vpop.f32.mrb[12].mxu1 }
 0x20c   : > { %v1156_v21 = vpack.c.bf16 %v827_v14, %v825_v13  ;;  %v673_v22 = vadd.f32 %v672_v19, %v1598_v15  ;;  %v674_v23 = vpop.f32.mrb[13].mxu1  ;;  %v776_v13 = vld [vmem:[%s1538_s15 + $0xb8] sm:$0xff] }
 0x20d   : > { %v675_v25 = vadd.f32 %v674_v23, %v1600_v16  ;;  %v676_v26 = vpop.f32.mrb[14].mxu1  ;;  %v1154_v28 = vpack.c.bf16 %v828_v18, %v826_v17 }
 0x20e   : > { %733 = vst [vmem:[%s1609_s18 + $0x60] sm:$0xff] %v673_v22  ;;  %v797_v29 = vsub.f32 %v765_v20, %v673_v22  ;;  %v677_v30 = vadd.f32 %v676_v26, %v1598_v15  ;;  %v678_v31 = vpop.f32.mrb[15].mxu1 }
 0x20f   : > { %734 = vst [vmem:[%s1609_s18 + $0x68] sm:$0xff] %v675_v25  ;;  %v798_v33 = vsub.f32 %v766_v24, %v675_v25  ;;  %v679_v34 = vadd.f32 %v678_v31, %v1600_v16  ;;  %1155 = vmatprep.subr.bf16.mxu0 %v1154_v28  ;;  %v777_v25 = vld [vmem:[%s1538_s15 + $0xc0] sm:$0xff] }
 0x210   : > { %735 = vst [vmem:[%s1609_s18 + $0x70] sm:$0xff] %v677_v30  ;;  %v799_v35 = vsub.f32 %v767_v27, %v677_v30  ;;  %1157 = vmatpush1.bf16.xpose.msra.mxu0 %v1156_v21  ;;  %v829_v37 = vmul.f32 %v797_v29, %v797_v29  ;;  %v778_v29 = vld [vmem:[%s1538_s15 + $0xc8] sm:$0xff] }
 0x211   : > { %736 = vst [vmem:[%s1609_s18 + $0x78] sm:$0xff] %v679_v34  ;;  %v800_v36 = vsub.f32 %v768_v32, %v679_v34  ;;  %v830_v39 = vmul.f32 %v798_v33, %v798_v33  ;;  %v779_v32 = vld [vmem:[%s1538_s15 + $0xd0] sm:$0xff] }
 0x212   : > { %v831_v38 = vmul.f32 %v799_v35, %v799_v35 }
 0x213   : > { %v832_v40 = vmul.f32 %v800_v36, %v800_v36  ;;  %v682_v41 = vpop.f32.mrb[16].mxu1 }
 0x214   : > { %v1160_v43 = vpack.c.bf16 %v831_v38, %v829_v37  ;;  %v683_v44 = vadd.f32 %v682_v41, %v1598_v15  ;;  %v684_v45 = vpop.f32.mrb[17].mxu1  ;;  %v780_v37 = vld [vmem:[%s1538_s15 + $0xd8] sm:$0xff] }
 0x215   : > { %v685_v47 = vadd.f32 %v684_v45, %v1600_v16  ;;  %v686_v48 = vpop.f32.mrb[18].mxu1  ;;  %v1158_v50 = vpack.c.bf16 %v832_v40, %v830_v39 }
 0x216   : > { %737 = vst [vmem:[%s1609_s18 + $0x80] sm:$0xff] %v683_v44  ;;  %v801_v51 = vsub.f32 %v769_v42, %v683_v44  ;;  %v687_v52 = vadd.f32 %v686_v48, %v1598_v15  ;;  %v688_v53 = vpop.f32.mrb[19].mxu1 }
 0x217   : > { %738 = vst [vmem:[%s1609_s18 + $0x88] sm:$0xff] %v685_v47  ;;  %v802_v55 = vsub.f32 %v770_v46, %v685_v47  ;;  %v689_v56 = vadd.f32 %v688_v53, %v1600_v16  ;;  %1159 = vmatprep.subr.bf16.mxu0 %v1158_v50  ;;  %v781_v47 = vld [vmem:[%s1538_s15 + $0xe0] sm:$0xff] }
 0x218   : > { %739 = vst [vmem:[%s1609_s18 + $0x90] sm:$0xff] %v687_v52  ;;  %v803_v57 = vsub.f32 %v771_v49, %v687_v52  ;;  %1161 = vmatpush1.bf16.xpose.msra.mxu0 %v1160_v43  ;;  %v833_v59 = vmul.f32 %v801_v51, %v801_v51  ;;  %v782_v51 = vld [vmem:[%s1538_s15 + $0xe8] sm:$0xff] }
 0x219   : > { %740 = vst [vmem:[%s1609_s18 + $0x98] sm:$0xff] %v689_v56  ;;  %v804_v58 = vsub.f32 %v772_v54, %v689_v56  ;;  %v834_v61 = vmul.f32 %v802_v55, %v802_v55  ;;  %v783_v54 = vld [vmem:[%s1538_s15 + $0xf0] sm:$0xff] }
 0x21a   : > { %v835_v60 = vmul.f32 %v803_v57, %v803_v57 }
 0x21b   : > { %v836_v62 = vmul.f32 %v804_v58, %v804_v58  ;;  %v692_v63 = vpop.f32.mrb[20].mxu1 }
 0x21c   : > { %v1164_v1 = vpack.c.bf16 %v835_v60, %v833_v59  ;;  %v693_v2 = vadd.f32 %v692_v63, %v1598_v15  ;;  %v694_v3 = vpop.f32.mrb[21].mxu1  ;;  %v784_v59 = vld [vmem:[%s1538_s15 + $0xf8] sm:$0xff]  ;;  %s941_s15 = sshll.u32 %s1609_s18, 4  ;;  %s1710_s15 = int_to_ptr.vmem [resolvable:$true] %s941_s15 }
 0x21d   : > { %v695_v5 = vadd.f32 %v694_v3, %v1600_v16  ;;  %v696_v6 = vpop.f32.mrb[22].mxu1  ;;  %v1162_v9 = vpack.c.bf16 %v836_v62, %v834_v61  ;;  %s1280_s9 = scalar_lea.vmem %s1710_s15, 4096  ;;  %p1287_p9 = scmp.lt.s32.totalorder %s1710_s15, %s1285_s8 }
 0x21e   : > { %741 = vst [vmem:[%s1609_s18 + $0xa0] sm:$0xff] %v693_v2  ;;  %v805_v10 = vsub.f32 %v773_v0, %v693_v2  ;;  %v697_v11 = vadd.f32 %v696_v6, %v1598_v15  ;;  %v698_v12 = vpop.f32.mrb[23].mxu1  ;;  %p1281_p6 = scmp.ne.s32.totalorder %s1710_s15, %s1280_s9  ;;  %p1288_p13 = scmp.lt.s32.totalorder %s1286_s28, %s1280_s9 }
 0x21f   : > { %742 = vst [vmem:[%s1609_s18 + $0xa8] sm:$0xff] %v695_v5  ;;  %v806_v14 = vsub.f32 %v774_v4, %v695_v5  ;;  %v699_v17 = vadd.f32 %v698_v12, %v1600_v16  ;;  %1163 = vmatprep.subr.bf16.mxu0 %v1162_v9 }
 0x220   : > { %743 = vst [vmem:[%s1609_s18 + $0xb0] sm:$0xff] %v697_v11  ;;  %v807_v18 = vsub.f32 %v775_v7, %v697_v11  ;;  %1165 = vmatpush1.bf16.xpose.msra.mxu0 %v1164_v1  ;;  %v837_v20 = vmul.f32 %v805_v10, %v805_v10  ;;  %p1282_p12 = pnand %p1281_p6, %p1798_p11  ;;  %p1289_p1 = por %p1288_p13, %p1287_p9 }
 0x221   : > { %744 = vst [vmem:[%s1609_s18 + $0xb8] sm:$0xff] %v699_v17  ;;  %v808_v19 = vsub.f32 %v776_v13, %v699_v17  ;;  %v838_v22 = vmul.f32 %v806_v14, %v806_v14 }
 0x222   : > { %v839_v21 = vmul.f32 %v807_v18, %v807_v18  ;;  %p1283_p8 = pneg %p1282_p12 }
 0x223   : > { %v840_v23 = vmul.f32 %v808_v19, %v808_v19  ;;  %v702_v24 = vpop.f32.mrb[24].mxu1 }
 0x224   : > { %v1168_v26 = vpack.c.bf16 %v839_v21, %v837_v20  ;;  %v703_v27 = vadd.f32 %v702_v24, %v1598_v15  ;;  %v704_v28 = vpop.f32.mrb[25].mxu1  ;;  %p1290_p3 = pnand %p1289_p1, %p1283_p8 }
 0x225   : > { %v705_v30 = vadd.f32 %v704_v28, %v1600_v16  ;;  %v706_v31 = vpop.f32.mrb[26].mxu1  ;;  %v1166_v33 = vpack.c.bf16 %v840_v23, %v838_v22 }
 0x226   : > { %745 = vst [vmem:[%s1609_s18 + $0xc0] sm:$0xff] %v703_v27  ;;  %v809_v34 = vsub.f32 %v777_v25, %v703_v27  ;;  %v707_v35 = vadd.f32 %v706_v31, %v1598_v15  ;;  %v708_v36 = vpop.f32.mrb[27].mxu1 }
 0x227   : > { %746 = vst [vmem:[%s1609_s18 + $0xc8] sm:$0xff] %v705_v30  ;;  %v810_v38 = vsub.f32 %v778_v29, %v705_v30  ;;  %v709_v39 = vadd.f32 %v708_v36, %v1600_v16  ;;  %1167 = vmatprep.subr.bf16.mxu0 %v1166_v33 }
 0x228   : > { %747 = vst [vmem:[%s1609_s18 + $0xd0] sm:$0xff] %v707_v35  ;;  %v811_v40 = vsub.f32 %v779_v32, %v707_v35  ;;  %1169 = vmatpush1.bf16.xpose.msra.mxu0 %v1168_v26  ;;  %v841_v42 = vmul.f32 %v809_v34, %v809_v34 }
 0x229   : > { %748 = vst [vmem:[%s1609_s18 + $0xd8] sm:$0xff] %v709_v39  ;;  %v812_v41 = vsub.f32 %v780_v37, %v709_v39  ;;  %v842_v44 = vmul.f32 %v810_v38, %v810_v38 }
 0x22a   : > { %v843_v43 = vmul.f32 %v811_v40, %v811_v40 }
 0x22b   : > { %v844_v45 = vmul.f32 %v812_v41, %v812_v41  ;;  %v712_v46 = vpop.f32.mrb[28].mxu1 }
 0x22c   : > { %v1172_v48 = vpack.c.bf16 %v843_v43, %v841_v42  ;;  %v713_v49 = vadd.f32 %v712_v46, %v1598_v15  ;;  %v714_v50 = vpop.f32.mrb[29].mxu1 }
 0x22d   : > { %v715_v52 = vadd.f32 %v714_v50, %v1600_v16  ;;  %v716_v53 = vpop.f32.mrb[30].mxu1  ;;  %v1170_v55 = vpack.c.bf16 %v844_v45, %v842_v44 }
 0x22e   : > { %749 = vst [vmem:[%s1609_s18 + $0xe0] sm:$0xff] %v713_v49  ;;  %v813_v56 = vsub.f32 %v781_v47, %v713_v49  ;;  %v717_v57 = vadd.f32 %v716_v53, %v1598_v15  ;;  %v718_v58 = vpop.f32.mrb[31].mxu1 }
 0x22f   : > { %750 = vst [vmem:[%s1609_s18 + $0xe8] sm:$0xff] %v715_v52  ;;  %v814_v60 = vsub.f32 %v782_v51, %v715_v52  ;;  %v719_v61 = vadd.f32 %v718_v58, %v1600_v16  ;;  %1171 = vmatprep.subr.bf16.mxu0 %v1170_v55 }
 0x230   : > { %751 = vst [vmem:[%s1609_s18 + $0xf0] sm:$0xff] %v717_v57  ;;  %v815_v62 = vsub.f32 %v783_v54, %v717_v57  ;;  %1173 = vmatpush1.bf16.xpose.msra.mxu0 %v1172_v48  ;;  %v845_v0 = vmul.f32 %v813_v56, %v813_v56 }
 0x231   : > { %752 = vst [vmem:[%s1609_s18 + $0xf8] sm:$0xff] %v719_v61  ;;  %v816_v63 = vsub.f32 %v784_v59, %v719_v61  ;;  %v846_v2 = vmul.f32 %v814_v60, %v814_v60 }
 0x232   : > { %v847_v1 = vmul.f32 %v815_v62, %v815_v62 }
 0x233   : > { %v848_v15 = vmul.f32 %v816_v63, %v816_v63 }
 0x234   : > { %v1176_v3 = vpack.c.bf16 %v847_v1, %v845_v0 }
 0x235   : > { %v1174_v4 = vpack.c.bf16 %v848_v15, %v846_v2 }
 0x237   : > { %1175 = vmatprep.subr.bf16.mxu0 %v1174_v4 }
 0x238   : > { %1177 = vmatpush1.bf16.xpose.msra.mxu0 %v1176_v3 }
 0x23f   : > { %914 = vmatmul.mubr.f32.vlgmr.msra.gmra.mrb[16].mxu0 %v1384_v8 }
 0x240   : > { %1293 = shalt.err (!%p1290_p3)
}
 0x241   : > { %s1294_s12 = scalar_lea.hbm %s1708_s29, 4096  ;;  %s1298_s17 = scalar_lea.hbm %s1790_s6, 16384 }
 0x242   : > { %p1295_p4 = scmp.ne.s32.totalorder %s1708_s29, %s1294_s12  ;;  %p1299_p2 = scmp.lt.u32.totalorder %s1708_s29, %s1790_s6 }
 0x243   : > { %p1300_p7 = scmp.lt.u32.totalorder %s1298_s17, %s1294_s12  ;;  %p1302_p6 = scmp.lt.u32.totalorder %s1294_s12, %s1708_s29 }
 0x244   : > { %p1296_p5 = pnand %p1295_p4, %p1798_p11 }
 0x245   : > { %p1301_p10 = por %p1300_p7, %p1299_p2 }
 0x246   : > { %p1297_p0 = pneg %p1296_p5 }
 0x247   : > { %p1303_p12 = por %p1302_p6, %p1301_p10 }
 0x249   : > { %p1304_p8 = pnand %p1303_p12, %p1297_p0 }
 0x24b   : > { %1307 = shalt.err (!%p1304_p8)
}
 0x24c   : > { %s1386_s9 = smov 256   ;;  %s1387_s21 = smov 16  }
 0x24d   : > { %1181 = dma.vmem_to_hbm [thread:$0]  (%p1798_p11), %s1710_s15, 4096, %s1708_s29, %s923_s19, %s1386_s9, %s1386_s9, %s1387_s21  }
 0x24e   : > { %s323_s8 = scalar_lea.vmem [#allocation6], %s1532_s16  ;;  %s1741_s18 = scalar_lea.hbm %s1791_s7, %s1545_s20 }
 0x24f   : > { %s957_s28 = sshll.u32 %s323_s8, 4  ;;  %s928_s17 = scalar_lea.sflag [#allocation7], %s1532_s16  ;;  %s1743_s28 = int_to_ptr.vmem [resolvable:$true] %s957_s28 }
 0x250   : > { %s1308_s22 = scalar_lea.vmem %s1743_s28, 16  ;;  %s1388_s15 = smov [#allocation6]  }
 0x251   : > { %p1309_p9 = scmp.ne.s32.totalorder %s1743_s28, %s1308_s22  ;;  %s1312_s29 = sshll.u32 %s1388_s15, 4  ;;  %s1313_s29 = int_to_ptr.vmem [resolvable:$false] %s1312_s29 }
 0x252   : > { %s1314_s19 = scalar_lea.vmem %s1313_s29, 32  ;;  %p1315_p3 = scmp.lt.s32.totalorder %s1743_s28, %s1313_s29 }
 0x253   : > { %p1310_p13 = pnand %p1309_p9, %p1798_p11  ;;  %p1316_p4 = scmp.lt.s32.totalorder %s1314_s19, %s1308_s22 }
 0x255   : > { %p1311_p1 = pneg %p1310_p13  ;;  %p1317_p5 = por %p1316_p4, %p1315_p3 }
 0x257   : > { %p1318_p0 = pnand %p1317_p5, %p1311_p1 }
 0x312   : > { %v915_v8 = vpop.f32.mrb[16].mxu0 }
 0x313   : > { %v919_v16 = vmul.f32 -50.0, %v915_v8  ;;  %v917_v5 = vpop.f32.mrb[17].mxu0 }
 0x315   : > { %v920_v6 = vadd.f32 354.21353, %v919_v16 }
 0x317   : > { %921 = vst [vmem:[%s323_s8] sm:$0x1] %v920_v6 }
 0x318   : > { %1321 = shalt.err (!%p1318_p0)
}
 0x319   : > { %s1322_s16 = scalar_lea.hbm %s1741_s18, 16  ;;  %s1326_s9 = scalar_lea.hbm %s1791_s7, 64 }
 0x31a   : > { %p1323_p2 = scmp.ne.s32.totalorder %s1741_s18, %s1322_s16  ;;  %p1327_p6 = scmp.lt.u32.totalorder %s1741_s18, %s1791_s7 }
 0x31b   : > { %p1328_p12 = scmp.lt.u32.totalorder %s1326_s9, %s1322_s16  ;;  %p1330_p9 = scmp.lt.u32.totalorder %s1322_s16, %s1741_s18 }
 0x31c   : > { %p1324_p7 = pnand %p1323_p2, %p1798_p11 }
 0x31d   : > { %p1329_p8 = por %p1328_p12, %p1327_p6 }
 0x31e   : > { %p1325_p10 = pneg %p1324_p7 }
 0x31f   : > { %p1331_p13 = por %p1330_p9, %p1329_p8 }
 0x321   : > { %p1332_p1 = pnand %p1331_p13, %p1325_p10 }
 0x323   : > { %1335 = shalt.err (!%p1332_p1)
}
 0x324   : > { %1182 = dma.vmem_to_hbm [thread:$0]  (%p1798_p11), %s1743_s28, 16, %s1741_s18, %s928_s17  }
 0x325 PF: > { %p1197_p3 = scmp.ge.s32.totalorder %s1378_s27, 2  ;;  %s969_s12 = sand.u32 1, %s1366_s24  }
 0x326   : > { %p1799_p4 = scmp.ne.s32.totalorder %s1796_s14, 0  ;;  %s970_s11 = scalar_lea.sflag [#allocation4], %s969_s12 }
 0x328   : > { %p1190_p5 = pnand %p1197_p3, %p1799_p4 }
 0x32a   : > { %1357 = dma.done.wait (!%p1190_p5), %s970_s11, 4096  }
 0x32b   : > { %1359 = vsyncadd (!%p1190_p5), %s970_s11, 4294963200  ;;  %s979_s22 = scalar_lea.sflag [#allocation7], %s969_s12 }
 0x32c   : > { %1361 = dma.done.wait (!%p1190_p5), %s979_s22, 16  }
 0x32d   : > { %1363 = vsyncadd (!%p1190_p5), %s979_s22, 4294967280  ;;  %p24_p11 = scmp.ge.s32.totalorder %s1454_s30, 6   ;;  %s1800_s24 = smov %s1370_s25 }
 0x32e   : > { %s1801_s25 = smov %s1374_s26  ;;  %s1802_s26 = smov %s1466_s10 }
 0x32f   : > { %s1803_s27 = smov %s1454_s30  ;;  %26 = sbr.rel (!%p24_p11) target bundleno = 7 (0x7), region = 109 }
 0x336   :  { %983 = vsyncpa [#allocation3], 1 }
 0x337   :  { %985 = vsyncpa [#allocation3 + $0x1], 1 }
 0x338   :  { %986 = vsyncpa [#allocation4], 1 }
 0x339   :  { %988 = vsyncpa [#allocation4 + $0x1], 1 }
 0x33a   :  { %989 = vsyncpa [#allocation7], 1 }
 0x33b   :  { %991 = vsyncpa [#allocation7 + $0x1], 1 }

</bundles_post_ra>
